<compile_context>
chip_gen: v7x
topology: tpu7x:2x2x1
jax: 0.10.0
libtpu: 0.0.40
codegen_flags: <defaults>
</compile_context>

<pallas_src>
import functools

import jax
import jax.numpy as jnp
from jax.experimental import pallas as pl
from jax.experimental.pallas import tpu as pltpu


def _task_decomp_kernel(attn_ref, feat_ref, wred_ref, out_ref, *, compute_dtype):
    # attn_ref: (1, 1, in_ch)  f32 per-sample channel scales (attn[s] repeated
    #                          over each contiguous group of feat_ch channels).
    # feat_ref: (1, in_ch, tile_hw)  lane-dense spatial tile, incoming dtype.
    # wred_ref: (feat_ch, in_ch) f32 reduction-conv weight (constant block).
    # Rescale in f32, round to compute dtype once (tighter than bf16 x bf16).
    conv_w = (wred_ref[...] * attn_ref[0]).astype(compute_dtype)   # (feat_ch, in_ch)
    x = feat_ref[0].astype(compute_dtype)                          # in-register cast
    out = jnp.dot(conv_w, x, preferred_element_type=jnp.float32)   # (feat_ch, tile_hw)
    out_ref[0] = jnp.maximum(out, 0.0).astype(out_ref.dtype)       # ReLU


def _vmem_capacity_bytes():
    try:
        info = pltpu.get_tpu_info()
        cap = getattr(info, "vmem_capacity_bytes", None)
        if cap:
            return int(cap)
    except Exception:
        pass
    return 64 * 1024 * 1024   # conservative: v7x per-TensorCore VMEM


def _pick_hw_tile(hw, batch, bytes_per_px, vmem_budget, target):
    """Pick the spatial (lane) tile.

    Largest multiple-of-128 tile <= target that fits the double-buffered VMEM
    budget; the grid uses cdiv so a partial edge block is masked by Pallas.
    If the whole map fits one tile we take the full extent (always legal).
    Keeps >= 2 grid steps when batch == 1 so both v7x TensorCores get work.
    """
    cap = max(128, (vmem_budget // max(bytes_per_px, 1)) // 128 * 128)
    tile = min(target, cap)
    if tile >= hw:
        tile = hw
    else:
        tile = max(128, (tile // 128) * 128)
    n_hw = -(-hw // tile)
    if batch * n_hw < 2 and hw > 128:
        half = -(-hw // 2)
        tile = max(128, ((half + 127) // 128) * 128)
        if tile >= hw:       # safety; unreachable for hw > 128 in practice
            tile = 128
    return tile


def task_decomposition(feat_nchw, w1, b1, w2, b2, w_red, *,
                       compute_dtype=jnp.bfloat16,
                       out_dtype=jnp.bfloat16,
                       hw_tile_target=16384):
    """feat_nchw: (B, in_ch, H, W); returns (B, feat_ch, H, W) in out_dtype."""
    B, in_ch, H, W = feat_nchw.shape
    feat_ch = w_red.shape[0]
    n_stack = w2.shape[0]
    assert in_ch == feat_ch * n_stack
    HW = H * W

    # ---- layer attention, hoisted out of the kernel (f32) -------------------
    avg = feat_nchw.astype(jnp.float32).mean(axis=(2, 3))          # (B, in_ch)
    hidden = jnp.maximum(avg @ w1.T + b1, 0.0)                     # (B, c_red)
    attn = jax.nn.sigmoid(hidden @ w2.T + b2)                      # (B, n_stack)
    # attn[b, s] scales channel group [s*feat_ch, (s+1)*feat_ch).
    attn_row = jnp.repeat(attn, feat_ch, axis=1).reshape(B, 1, in_ch)
    attn_row = attn_row.astype(jnp.float32)

    # Feat goes in as-is (cast happens in-register inside the kernel).
    feat = feat_nchw.reshape(B, in_ch, HW)

    feat_bytes = feat.dtype.itemsize
    out_bytes = jnp.dtype(out_dtype).itemsize
    # Per spatial pixel, double-buffered (2-deep pipeline): feat read + out write.
    bytes_per_px = 2 * (in_ch * feat_bytes + feat_ch * out_bytes)

    vmem_cap = _vmem_capacity_bytes()
    data_budget = int(vmem_cap * 0.6)

    tile_hw = _pick_hw_tile(HW, B, bytes_per_px, data_budget, hw_tile_target)
    n_hw = pl.cdiv(HW, tile_hw)

    weights_bytes = 2 * (feat_ch * in_ch + in_ch) * 4              # w_red + attn, dbl-buf
    footprint = tile_hw * bytes_per_px + weights_bytes
    vmem_limit = int(min(vmem_cap * 0.85, footprint + 8 * 1024 * 1024))

    out = pl.pallas_call(
        functools.partial(_task_decomp_kernel, compute_dtype=compute_dtype),
        out_shape=jax.ShapeDtypeStruct((B, feat_ch, HW), out_dtype),
        grid_spec=pltpu.PrefetchScalarGridSpec(
            num_scalar_prefetch=0,
            grid=(B, n_hw),
            in_specs=[
                pl.BlockSpec((1, 1, in_ch), lambda b, s: (b, 0, 0)),
                pl.BlockSpec((1, in_ch, tile_hw), lambda b, s: (b, 0, s)),
                pl.BlockSpec((feat_ch, in_ch), lambda b, s: (0, 0)),
            ],
            out_specs=pl.BlockSpec((1, feat_ch, tile_hw), lambda b, s: (b, 0, s)),
        ),
        compiler_params=pltpu.CompilerParams(
            dimension_semantics=("parallel", "parallel"),
            vmem_limit_bytes=vmem_limit,
        ),
    )(attn_row, feat, w_red.astype(jnp.float32))
    return out.reshape(B, feat_ch, H, W)


def reference(feat, w1, b1, w2, b2, w_red):
    """Pure-JAX f32 mirror of the PyTorch forward."""
    B, in_ch, H, W = feat.shape
    feat_ch = w_red.shape[0]
    n_stack = w2.shape[0]
    avg = feat.mean(axis=(2, 3))
    hidden = jnp.maximum(avg @ w1.T + b1, 0.0)
    attn = jax.nn.sigmoid(hidden @ w2.T + b2)                      # (B, S)
    conv_w = attn[:, None, :, None] * w_red.reshape(1, feat_ch, n_stack, feat_ch)
    conv_w = conv_w.reshape(B, feat_ch, in_ch)
    out = jnp.einsum("bfc,bcp->bfp", conv_w, feat.reshape(B, in_ch, H * W))
    return jnp.maximum(out, 0.0).reshape(B, feat_ch, H, W)


if __name__ == "__main__":
    # Module hyperparameters (TOOD head defaults, small feat_channels).
    feat_channels = 32
    stacked_convs = 6
    la_down_rate = 8
    in_channels = feat_channels * stacked_convs            # 192
    c_red = in_channels // la_down_rate                    # 24

    key = jax.random.PRNGKey(0)
    k_w1, k_w2, k_wred, k_f1, k_f2, k_f3 = jax.random.split(key, 6)

    # init_weights(): layer_attention convs normal(0, 0.001), bias 0;
    # reduction conv normal(0, 0.01), bias 0 (unused in forward).
    w1 = 0.001 * jax.random.normal(k_w1, (c_red, in_channels), jnp.float32)
    b1 = jnp.zeros((c_red,), jnp.float32)
    w2 = 0.001 * jax.random.normal(k_w2, (stacked_convs, c_red), jnp.float32)
    b2 = jnp.zeros((stacked_convs,), jnp.float32)
    w_red = 0.01 * jax.random.normal(k_wred, (feat_channels, in_channels),
                                     jnp.float32)

    def check(out, ref, rtol, atol, name):
        ok = jnp.allclose(out.astype(jnp.float32), ref, rtol=rtol, atol=atol)
        err = float(jnp.max(jnp.abs(out.astype(jnp.float32) - ref)))
        assert bool(ok), (name, err)

    # Case 1: small map, single spatial tile per sample, default bf16 output.
    B, H, W = 2, 16, 16
    feat = jax.random.normal(k_f1, (B, in_channels, H, W), jnp.float32)
    out = jax.block_until_ready(task_decomposition(feat, w1, b1, w2, b2, w_red))
    ref = reference(feat, w1, b1, w2, b2, w_red)
    assert out.shape == (B, feat_channels, H, W) and out.dtype == jnp.bfloat16
    check(out, ref, 2e-2, 5e-3, "case1")

    # Case 2: HW=384 with a forced 256 tile -> 2 spatial steps, the second a
    # masked partial edge block (128 valid cols); f32 output.
    B2, H2, W2 = 2, 16, 24
    feat2 = jax.random.normal(k_f2, (B2, in_channels, H2, W2), jnp.float32)
    out2 = jax.block_until_ready(
        task_decomposition(feat2, w1, b1, w2, b2, w_red,
                           out_dtype=jnp.float32, hw_tile_target=256))
    ref2 = reference(feat2, w1, b1, w2, b2, w_red)
    assert out2.shape == (B2, feat_channels, H2, W2)
    check(out2, ref2, 1e-2, 5e-3, "case2")

    # Case 3: B=1 with non-128-divisible HW=300: exercises the megacore split
    # (tile forced below full extent so the grid has 2 steps) and the masked,
    # non-aligned edge block (44 valid cols).
    B3, H3, W3 = 1, 10, 30
    feat3 = jax.random.normal(k_f3, (B3, in_channels, H3, W3), jnp.float32)
    out3 = jax.block_until_ready(
        task_decomposition(feat3, w1, b1, w2, b2, w_red, out_dtype=jnp.float32))
    ref3 = reference(feat3, w1, b1, w2, b2, w_red)
    assert out3.shape == (B3, feat_channels, H3, W3)
    check(out3, ref3, 1e-2, 5e-3, "case3")

    print("KERNEL_OK")
</pallas_src>

<mosaic_0001>
module attributes {stable_mosaic.version = 11 : i64} {
  func.func @_task_decomp_kernel(%arg0: i32, %arg1: i32, %arg2: memref<1x1x192xf32, #tpu.memory_space<vmem>>, %arg3: memref<1x192x256xf32, #tpu.memory_space<vmem>>, %arg4: memref<32x192xf32, #tpu.memory_space<vmem>>, %arg5: memref<1x32x256xbf16, #tpu.memory_space<vmem>>) attributes {dimension_semantics = [#tpu.dimension_semantics<parallel>, #tpu.dimension_semantics<parallel>], iteration_bounds = array<i64: 2, 1>, scalar_prefetch = 0 : i64, scratch_operands = 0 : i64, tpu.core_type = #tpu.core_type<tc>, window_params = [{transform_indices = @transform_0, window_bounds = array<i64: 1, 1, 192>}, {transform_indices = @transform_1, window_bounds = array<i64: 1, 192, 256>}, {pipeline_mode = #tpu.pipeline_mode<synchronous>, transform_indices = @transform_2, window_bounds = array<i64: 32, 192>}, {transform_indices = @transform_3, window_bounds = array<i64: 1, 32, 256>}]} {
    %c0 = arith.constant 0 : index
    %c0_0 = arith.constant 0 : index
    %0 = vector.load %arg4[%c0, %c0_0] : memref<32x192xf32, #tpu.memory_space<vmem>>, vector<32x192xf32>
    %c0_1 = arith.constant 0 : index
    %c0_2 = arith.constant 0 : index
    %c0_3 = arith.constant 0 : index
    %1 = vector.load %arg2[%c0_1, %c0_2, %c0_3] : memref<1x1x192xf32, #tpu.memory_space<vmem>>, vector<1x1x192xf32>
    %2 = vector.shape_cast %1 : vector<1x1x192xf32> to vector<1x192xf32>
    %3 = vector.broadcast %2 : vector<1x192xf32> to vector<32x192xf32>
    %4 = arith.mulf %0, %3 : vector<32x192xf32>
    %5 = arith.truncf %4 : vector<32x192xf32> to vector<32x192xbf16>
    %c0_4 = arith.constant 0 : index
    %c0_5 = arith.constant 0 : index
    %c0_6 = arith.constant 0 : index
    %6 = vector.load %arg3[%c0_4, %c0_5, %c0_6] : memref<1x192x256xf32, #tpu.memory_space<vmem>>, vector<1x192x256xf32>
    %7 = vector.shape_cast %6 : vector<1x192x256xf32> to vector<192x256xf32>
    %8 = arith.truncf %7 : vector<192x256xf32> to vector<192x256xbf16>
    %cst = arith.constant dense<0.000000e+00> : vector<32x256xf32>
    %9 = tpu.matmul %5, %8, %cst {dimension_numbers = #tpu.dot_dimension_numbers<[1], [0], [0], [1], [0, 0, 1, 1], [], []>} : vector<32x192xbf16>, vector<192x256xbf16>, vector<32x256xf32> -> vector<32x256xf32>
    %cst_7 = arith.constant 0.000000e+00 : f32
    %10 = vector.broadcast %cst_7 : f32 to vector<32x256xf32>
    %11 = arith.maximumf %9, %10 : vector<32x256xf32>
    %12 = arith.truncf %11 : vector<32x256xf32> to vector<32x256xbf16>
    %c0_8 = arith.constant 0 : index
    %c0_9 = arith.constant 0 : index
    %c0_10 = arith.constant 0 : index
    %13 = vector.load %arg5[%c0_8, %c0_9, %c0_10] : memref<1x32x256xbf16, #tpu.memory_space<vmem>>, vector<1x32x256xbf16>
    %14 = vector.shape_cast %13 : vector<1x32x256xbf16> to vector<32x256xbf16>
    %15 = vector.shape_cast %12 : vector<32x256xbf16> to vector<1x32x256xbf16>
    tpu.vector_store %arg5[%c0_8, %c0_9, %c0_10], %15 {strides = array<i32>} : memref<1x32x256xbf16, #tpu.memory_space<vmem>>, vector<1x32x256xbf16>,
    return
  }
  func.func @transform_0(%arg0: i32, %arg1: i32) -> (i32, i32, i32) {
    %c0_i32 = arith.constant 0 : i32
    %c0_i32_0 = arith.constant 0 : i32
    %c0_i32_1 = arith.constant 0 : i32
    return %arg0, %c0_i32, %c0_i32_0 : i32, i32, i32
  }
  func.func @transform_1(%arg0: i32, %arg1: i32) -> (i32, i32, i32) {
    %c0_i32 = arith.constant 0 : i32
    %c0_i32_0 = arith.constant 0 : i32
    return %arg0, %c0_i32, %arg1 : i32, i32, i32
  }
  func.func @transform_2(%arg0: i32, %arg1: i32) -> (i32, i32) {
    %c0_i32 = arith.constant 0 : i32
    %c0_i32_0 = arith.constant 0 : i32
    %c0_i32_1 = arith.constant 0 : i32
    return %c0_i32, %c0_i32_0 : i32, i32
  }
  func.func @transform_3(%arg0: i32, %arg1: i32) -> (i32, i32, i32) {
    %c0_i32 = arith.constant 0 : i32
    %c0_i32_0 = arith.constant 0 : i32
    return %arg0, %c0_i32, %arg1 : i32, i32, i32
  }
}

</mosaic_0001>

<bundles_post_ra>
// kernel: tpu_custom_call.1
= control target key start
LH: loop header
LB: loop body
LE: loop exit
PB: predicated region body
PF: predicated region fallthrough
CT: control target
= control target key end

     0   :  { %s1276_s0 = inlined_call_operand.hbm [shape: f32[2,1,192], index: 0, kind: input, shape index: {}]   ;;  %s1277_s1 = inlined_call_operand.hbm [shape: f32[2,192,256], index: 1, kind: input, shape index: {}]   ;;  %s1278_s2 = inlined_call_operand.hbm [shape: f32[32,192], index: 2, kind: input, shape index: {}]   ;;  %s1279_s3 = inlined_call_operand.hbm [shape: bf16[2,32,256], index: 3, kind: output, shape index: {}]  }
   0x1   :  { %1285 = sst [smem:[#allocation13_spill]] %s1276_s0 }
   0x2   :  { %8 = vsyncpa [#allocation3], 0 }
   0x3   :  { %10 = vsyncpa [#allocation3 + $0x1], 0 }
   0x4   :  { %11 = vsyncpa [#allocation6], 0 }
   0x5   :  { %13 = vsyncpa [#allocation6 + $0x1], 0 }
   0x6   :  { %14 = vsyncpa [#allocation4], 0 }
   0x7   :  { %16 = vsyncpa [#allocation4 + $0x1], 0  ;;  %s944_s12 = smov 0   ;;  %s946_s13 = smov 0  }
   0x8   :  { %s948_s14 = smov 0   ;;  %s950_s15 = smov 0  }
   0x9   :  { %s952_s16 = smov 0   ;;  %s954_s17 = smov 0  }
   0xa LB: > { %s975_s18 = sadd.s32 4294967295, %s914_s17   ;;  %s598_s19 = sadd.s32 4294967294, %s914_s17   ;;  %s914_s17 = sphi %s954_s17, %s22_s17   ;;  %s910_s16 = sphi %s952_s16, %s1308_s16   ;;  %s906_s15 = sphi %s950_s15, %s1307_s15   ;;  %s902_s14 = sphi %s948_s14, %s1306_s14   ;;  %s898_s13 = sphi %s946_s13, %s1305_s13   ;;  %s894_s12 = sphi %s944_s12, %s1304_s12  }
   0xb   : > { %p54_p0 = scmp.ne.s32.totalorder %s898_s13, %s894_s12  ;;  %p1280_p1 = scmp.eq.s32.totalorder %s975_s18, 0 }
   0xc   : > { %p135_p3 = scmp.eq.s32.totalorder %s598_s19, 1  ;;  %p599_p5 = scmp.ge.s32.totalorder %s914_s17, 1 }
   0xd   : > { %p984_p4 = por %p1280_p1, %p54_p0  ;;  %p142_p7 = scmp.lt.s32.totalorder %s914_s17, 3 }
   0xe   : > { %p989_p6 = por %p135_p3, %p54_p0  ;;  %s916_s23 = smov [#allocation7]  }
   0xf   : > { %s1286_s20 = scalar_select %p984_p4, 1, 0 }
  0x10   : > { %s1287_s21 = scalar_select %p989_p6, 1, 0 }
  0x11   : > { %p994_p8 = pnand %p599_p5, %p142_p7  ;;  %s154_s24 = sshll.u32 %s916_s23, 4  ;;  %s155_s24 = int_to_ptr.vmem [resolvable:$true] %s154_s24 }
  0x12   : > { %s34_s26 = sadd.s32 1, %s910_s16  ;;  %s736_s29 = scalar_lea.hbm %s1278_s2, 1024 }
  0x13   : > { %s1288_s22 = scalar_select %p994_p8, 1, 0 }
  0x14   : > { %p664_p9 = pneg %p994_p8  ;;  %p737_p12 = scmp.ne.s32.totalorder %s1278_s2, %s736_s29 }
  0x15   : > { %p743_p5 = scmp.lt.u32.totalorder %s736_s29, %s1278_s2 }
  0x16   : > { %p1003_p11 = pnand %p664_p9, %p1280_p1 }
  0x18   : > { %p738_p13 = pneg %p1003_p11 }
  0x1a   : > { %p739_p0 = pnand %p738_p13, %p737_p12 }
  0x1c   : > { %p740_p3 = pneg %p739_p0 }
  0x1e   : > { %p745_p7 = pnand %p743_p5, %p740_p3 }
  0x20   : > { %748 = shalt.err (!%p745_p7)
}
  0x21   : > { %s749_s7 = scalar_lea.vmem %s155_s24, 1024  ;;  %p757_p2 = scmp.lt.s32.totalorder %s155_s24, %s155_s24 }
  0x22   : > { %p750_p9 = scmp.ne.s32.totalorder %s155_s24, %s749_s7  ;;  %p758_p6 = scmp.lt.s32.totalorder %s749_s7, %s749_s7 }
  0x24   : > { %p752_p10 = pnand %p750_p9, %p738_p13  ;;  %p759_p4 = por %p758_p6, %p757_p2 }
  0x26   : > { %p753_p1 = pneg %p752_p10 }
  0x28   : > { %p760_p8 = pnand %p759_p4, %p753_p1 }
  0x2a   : > { %763 = shalt.err (!%p760_p8)
}
  0x2b   : > { %s1283_s8 = smov 256   ;;  %s1284_s9 = smov 16  }
  0x2c   : > { %667 = dma.hbm_to_vmem [thread:$0]  (!%p1003_p11), %s1278_s2, 1024, %s155_s24, [#allocation6], %s1283_s8, %s1283_s8, %s1284_s9  }
  0x2d   : > { %p36_p1 = scmp.ge.s32.totalorder %s34_s26, 2  ;;  %s41_s19 = sadd.s32 1, %s902_s14 }
  0x2e   : > { %p48_p2 = scmp.ne.s32.totalorder %s902_s14, %s898_s13  ;;  %p49_p4 = scmp.eq.s32.totalorder %s914_s17, 0 }
  0x2f   : > { %s1310_s26 = smov (%p36_p1, %s34_s26), 0  ;;  %p1291_p8 = scmp.eq.s32.totalorder %s975_s18, 1 }
  0x30   : > { %p1033_p6 = por %p49_p4, %p48_p2  ;;  %s38_s24 = ssub.s32 %s910_s16, %s1310_s26 }
  0x31   : > { %p1039_p10 = por %p1291_p8, %p48_p2  ;;  %p680_p11 = scmp.lt.s32.totalorder %s914_s17, 2 }
  0x32   : > { %p39_p12 = scmp.eq.s32.totalorder %s38_s24, 0  ;;  %s1047_s27 = sand.u32 1, %s902_s14  }
  0x33   : > { %s602_s28 = sshll.u32 %s1047_s27, 1  ;;  %s621_s30 = sshll.u32 %s910_s16, 5 }
  0x34   : > { %s1051_s29 = scalar_select %p39_p12, %s902_s14, %s41_s19  }
  0x35   : > { %s1293_s0 = sld [smem:[#allocation13_spill]]  ;;  %s172_s7 = scalar_lea.vmem [#allocation2], %s602_s28 }
  0x36   : > { %s180_s10 = sshll.u32 %s172_s7, 4  ;;  %p1063_p13 = pnand %p680_p11, %p1033_p6  ;;  %s1059_s10 = int_to_ptr.vmem [resolvable:$true] %s180_s10 }
  0x37   : > { %s651_s19 = smul.u32 384, %s1047_s27 }
  0x38   : > { %s652_s4 = smul.u32 6144, %s910_s16  ;;  %p766_p3 = pneg %p1063_p13 }
  0x3b   : > { %s1057_s6 = scalar_lea.hbm %s1293_s0, %s621_s30  ;;  %s169_s30 = scalar_lea.sflag [#allocation3], %s1047_s27 }
  0x3c   : > { %s764_s5 = scalar_lea.hbm %s1057_s6, 32  ;;  %s769_s7 = scalar_lea.hbm %s1293_s0, 64 }
  0x3d   : > { %p765_p0 = scmp.ne.s32.totalorder %s1057_s6, %s764_s5  ;;  %p770_p9 = scmp.lt.u32.totalorder %s1057_s6, %s1293_s0 }
  0x3e   : > { %p771_p1 = scmp.lt.u32.totalorder %s769_s7, %s764_s5  ;;  %p773_p4 = scmp.lt.u32.totalorder %s764_s5, %s1057_s6 }
  0x3f   : > { %p767_p5 = pnand %p766_p3, %p765_p0 }
  0x40   : > { %p772_p2 = por %p771_p1, %p770_p9 }
  0x41   : > { %p768_p7 = pneg %p767_p5 }
  0x42   : > { %p774_p6 = por %p773_p4, %p772_p2 }
  0x44   : > { %p775_p8 = pnand %p774_p6, %p768_p7 }
  0x46   : > { %778 = shalt.err (!%p775_p8)
}
  0x47   : > { %s779_s24 = scalar_lea.vmem %s1059_s10, 32  ;;  %s919_s28 = smov [#allocation2]  }
  0x48   : > { %p780_p11 = scmp.ne.s32.totalorder %s1059_s10, %s779_s24  ;;  %s784_s23 = sshll.u32 %s919_s28, 4  ;;  %s785_s23 = int_to_ptr.vmem [resolvable:$false] %s784_s23 }
  0x49   : > { %s786_s8 = scalar_lea.vmem %s785_s23, 64  ;;  %p787_p5 = scmp.lt.s32.totalorder %s1059_s10, %s785_s23 }
  0x4a   : > { %p782_p12 = pnand %p780_p11, %p766_p3  ;;  %p788_p9 = scmp.lt.s32.totalorder %s786_s8, %s779_s24 }
  0x4c   : > { %p783_p0 = pneg %p782_p12  ;;  %p789_p1 = por %p788_p9, %p787_p5 }
  0x4e   : > { %p790_p2 = pnand %p789_p1, %p783_p0 }
  0x50   : > { %793 = shalt.err (!%p790_p2)
}
  0x51   : > { %671 = dma.hbm_to_vmem [thread:$0]  (!%p1063_p13), %s1057_s6, 32, %s1059_s10, %s169_s30  }
  0x52   : > { %s191_s9 = scalar_lea.vmem [#allocation5], %s651_s19  ;;  %s1103_s24 = scalar_lea.hbm %s1277_s1, %s652_s4 }
  0x53   : > { %s200_s5 = sshll.u32 %s191_s9, 4  ;;  %s1295_s23 = sand.u32 1, %s914_s17   ;;  %s1105_s5 = int_to_ptr.vmem [resolvable:$true] %s200_s5 }
  0x54   : > { %s1109_s8 = scalar_lea.sflag [#allocation6], %s1295_s23  ;;  %s794_s0 = scalar_lea.hbm %s1103_s24, 6144 }
  0x55   : > { %p795_p7 = scmp.ne.s32.totalorder %s1103_s24, %s794_s0  ;;  %s799_s10 = scalar_lea.hbm %s1277_s1, 12288 }
  0x56   : > { %p800_p8 = scmp.lt.u32.totalorder %s1103_s24, %s1277_s1  ;;  %p801_p11 = scmp.lt.u32.totalorder %s799_s10, %s794_s0 }
  0x57   : > { %p797_p4 = pnand %p795_p7, %p766_p3  ;;  %p803_p0 = scmp.lt.u32.totalorder %s794_s0, %s1103_s24 }
  0x58   : > { %p802_p12 = por %p801_p11, %p800_p8 }
  0x59   : > { %p798_p6 = pneg %p797_p4 }
  0x5a   : > { %p804_p5 = por %p803_p0, %p802_p12 }
  0x5c   : > { %p805_p9 = pnand %p804_p5, %p798_p6 }
  0x5e   : > { %808 = shalt.err (!%p805_p9)
}
  0x5f   : > { %s809_s30 = scalar_lea.vmem %s1105_s5, 6144  ;;  %s920_s9 = smov [#allocation5]  }
  0x60   : > { %p810_p1 = scmp.ne.s32.totalorder %s1105_s5, %s809_s30  ;;  %s814_s7 = sshll.u32 %s920_s9, 4  ;;  %s815_s7 = int_to_ptr.vmem [resolvable:$false] %s814_s7 }
  0x61   : > { %s816_s28 = scalar_lea.vmem %s815_s7, 12288  ;;  %p817_p4 = scmp.lt.s32.totalorder %s1105_s5, %s815_s7 }
  0x62   : > { %p812_p2 = pnand %p810_p1, %p766_p3  ;;  %p818_p8 = scmp.lt.s32.totalorder %s816_s28, %s809_s30 }
  0x64   : > { %p813_p7 = pneg %p812_p2  ;;  %p819_p11 = por %p818_p8, %p817_p4 }
  0x66   : > { %p820_p12 = pnand %p819_p11, %p813_p7 }
  0x68   : > { %823 = shalt.err (!%p820_p12)
}
  0x69   : > { %s1296_s0 = smov 16   ;;  %s1297_s23 = smov 256  }
  0x6a   : > { %674 = dma.hbm_to_vmem [thread:$0]  (!%p1063_p13), %s1103_s24, 6144, %s1105_s5, %s1109_s8, %s1297_s23, %s1297_s23, %s1296_s0  }
  0x6b   : > { %p1298_p3 = scmp.ne.s32.totalorder %s1288_s22, 0 }
  0x6c   : > { %s1141_s27 = sand.u32 (!%p1298_p3), 1, %s898_s13   ;;  %p1299_p6 = scmp.ne.s32.totalorder (!%p1298_p3), %s1286_s20, 0 }
  0x6d   : > { %212 = sbr.rel (%p1298_p3) target bundleno = 409 (0x199), region = 32  ;;  %s607_s6 = sshll.u32 (!%p1298_p3), %s1141_s27, 1 }
  0x6e   : > { %s215_s10 = scalar_lea.sflag (!%p1298_p3), [#allocation3], %s1141_s27  ;;  %s1145_s19 = scalar_lea.vmem (!%p1298_p3), [#allocation2], %s607_s6 }
  0x74   : > { %877 = dma.done.wait (%p1299_p6), %s215_s10, 32  }
  0x75   : > { %879 = vsyncadd (%p1299_p6), %s215_s10, 4294967264  ;;  %s223_s22 = sand.u32 1, %s975_s18   ;;  %s653_s11 = smul.u32 384, %s1141_s27 }
  0x76   : > { %s224_s5 = scalar_lea.sflag [#allocation6], %s223_s22 }
  0x77   : > { %s1153_s24 = scalar_lea.vmem [#allocation5], %s653_s11 }
  0x78   : > { %881 = dma.done.wait (%p1299_p6), %s224_s5, 6144  }
  0x79   : > { %883 = vsyncadd (%p1299_p6), %s224_s5, 4294961152  ;;  %p1300_p13 = scmp.eq.s32.totalorder %s975_s18, 0 }
  0x7b   : > { %885 = dma.done.wait (%p1300_p13), [#allocation6], 1024   ;;  %p1301_p0 = pmov %p1300_p13 }
  0x7c   : > { %v295_v0 = vld [vmem:[%s1153_s24 + $0x8] sm:$0xff]  ;;  %v297_v1 = vld [vmem:[%s1153_s24 + $0x18] sm:$0xff]  ;;  %v294_v2 = vld [vmem:[%s1153_s24] sm:$0xff]  ;;  %v272_v17 = vlaneseq  ;;  %vm366_vm0 = vcmask 523264   ;;  %s609_s18 = sshll.u32 %s1141_s27, 5  ;;  %s626_s4 = sshll.u32 %s906_s15, 9 }
  0x7d   : > { %887 = vsyncadd (%p1301_p0), [#allocation6], 4294966272  ;;  %v343_v3 = vpack.c.bf16 %v297_v1, %v295_v0  ;;  %v296_v4 = vld [vmem:[%s1153_s24 + $0x10] sm:$0xff]  ;;  %v299_v5 = vld [vmem:[%s1153_s24 + $0x28] sm:$0xff]  ;;  %s258_s20 = scalar_lea.vmem [#allocation8], %s609_s18  ;;  %s1227_s7 = scalar_lea.hbm %s1279_s3, %s626_s4 }
  0x7e   : > { %v301_v6 = vld [vmem:[%s1153_s24 + $0x38] sm:$0xff]  ;;  %v342_v7 = vpack.c.bf16 %v296_v4, %v294_v2  ;;  %v298_v9 = vld [vmem:[%s1153_s24 + $0x20] sm:$0xff]  ;;  %v300_v10 = vld [vmem:[%s1153_s24 + $0x30] sm:$0xff]  ;;  %v1179_v24 = vshrl.u32 %v272_v17, 7  ;;  %s478_s8 = sshll.u32 %s258_s20, 4  ;;  %s463_s15 = scalar_lea.sflag [#allocation4], %s1141_s27  ;;  %s1222_s8 = int_to_ptr.vmem [resolvable:$true] %s478_s8 }
  0x7f   : > { %v345_v8 = vpack.c.bf16 %v301_v6, %v299_v5  ;;  %v303_v11 = vld [vmem:[%s1153_s24 + $0x48] sm:$0xff]  ;;  %373 = vmatprep.subr.bf16.mxu0 %v343_v3  ;;  %627 = vmatprep.subr.bf16.mxu1 %v343_v3  ;;  %v305_v12 = vld [vmem:[%s1153_s24 + $0x58] sm:$0xff]  ;;  %v344_v13 = vpack.c.bf16 %v300_v10, %v298_v9  ;;  %v302_v15 = vld [vmem:[%s1153_s24 + $0x40] sm:$0xff]  ;;  %s824_s28 = scalar_lea.vmem %s1222_s8, 512  ;;  %s921_s0 = smov [#allocation8]  }
  0x80   : > { %374 = vmatpush1.bf16.msra.mxu0 %v342_v7  ;;  %639 = vmatpush1.bf16.msra.mxu1 %v342_v7  ;;  %v347_v14 = vpack.c.bf16 %v305_v12, %v303_v11  ;;  %v304_v16 = vld [vmem:[%s1153_s24 + $0x50] sm:$0xff]  ;;  %v307_v18 = vld [vmem:[%s1153_s24 + $0x68] sm:$0xff]  ;;  %v309_v19 = vld [vmem:[%s1153_s24 + $0x78] sm:$0xff]  ;;  %v278_v31 = vsub.s32 1, %v1179_v24  ;;  %v274_v12 = vsub.s32 0, %v1179_v24  ;;  %p825_p5 = scmp.ne.s32.totalorder %s1222_s8, %s824_s28  ;;  %s828_s23 = sshll.u32 %s921_s0, 4  ;;  %s829_s23 = int_to_ptr.vmem [resolvable:$false] %s828_s23 }
  0x81   : > { %375 = vmatprep.subr.bf16.mxu0 %v345_v8  ;;  %628 = vmatprep.subr.bf16.mxu1 %v345_v8  ;;  %v346_v20 = vpack.c.bf16 %v304_v16, %v302_v15  ;;  %v349_v21 = vpack.c.bf16 %v309_v19, %v307_v18  ;;  %v306_v22 = vld [vmem:[%s1153_s24 + $0x60] sm:$0xff]  ;;  %v308_v23 = vld [vmem:[%s1153_s24 + $0x70] sm:$0xff]  ;;  %v311_v25 = vld [vmem:[%s1153_s24 + $0x88] sm:$0xff]  ;;  %s830_s6 = scalar_lea.vmem %s829_s23, 1024  ;;  %p831_p2 = scmp.lt.s32.totalorder %s1222_s8, %s829_s23 }
  0x82   : > { %v313_v26 = vld [vmem:[%s1153_s24 + $0x98] sm:$0xff]  ;;  %v348_v27 = vpack.c.bf16 %v308_v23, %v306_v22  ;;  %v310_v29 = vld [vmem:[%s1153_s24 + $0x80] sm:$0xff]  ;;  %v312_v30 = vld [vmem:[%s1153_s24 + $0x90] sm:$0xff]  ;;  %p826_p9 = pnand %p825_p5, %p1039_p10  ;;  %p832_p7 = scmp.lt.s32.totalorder %s830_s6, %s824_s28 }
  0x83   : > { %v351_v28 = vpack.c.bf16 %v313_v26, %v311_v25  ;;  %v315_v32 = vld [vmem:[%s1153_s24 + $0xa8] sm:$0xff]  ;;  %v317_v33 = vld [vmem:[%s1153_s24 + $0xb8] sm:$0xff]  ;;  %v314_v34 = vld [vmem:[%s1153_s24 + $0xa0] sm:$0xff]  ;;  %v350_v35 = vpack.c.bf16 %v312_v30, %v310_v29 }
  0x84   : > { %376 = vmatpush1.bf16.msra.mxu0 %v344_v13  ;;  %640 = vmatpush1.bf16.msra.mxu1 %v344_v13  ;;  %v263_v36 = vld [vmem:[#allocation7 + $0x8] sm:$0xff]  ;;  %v265_v37 = vld [vmem:[#allocation7 + $0x18] sm:$0xff]  ;;  %v353_v39 = vpack.c.bf16 %v317_v33, %v315_v32  ;;  %v316_v40 = vld [vmem:[%s1153_s24 + $0xb0] sm:$0xff]  ;;  %p827_p1 = pneg %p826_p9  ;;  %p833_p4 = por %p832_p7, %p831_p2 }
  0x85   : > { %377 = vmatprep.subr.bf16.mxu0 %v347_v14  ;;  %629 = vmatprep.subr.bf16.mxu1 %v347_v14  ;;  %v1190_v38 = vld [vmem:[%s1145_s19] sm:$0x3]  ;;  %v267_v42 = vld [vmem:[#allocation7 + $0x28] sm:$0xff]  ;;  %v352_v50 = vpack.c.bf16 %v316_v40, %v314_v34  ;;  %v318_v52 = vld [vmem:[%s1153_s24 + $0xc0] sm:$0xff] }
  0x86   : > { %v279_v41 = vrot.slane %v1190_v38, %v278_v31  ;;  %v269_v43 = vld [vmem:[#allocation7 + $0x38] sm:$0xff]  ;;  %v319_v44 = vld [vmem:[%s1153_s24 + $0xc8] sm:$0xff]  ;;  %v320_v53 = vld [vmem:[%s1153_s24 + $0xd0] sm:$0xff]  ;;  %v275_v19 = vrot.slane %v1190_v38, %v274_v12  ;;  %p834_p8 = pnand %p833_p4, %p827_p1 }
  0x87   : > { %v321_v45 = vld [vmem:[%s1153_s24 + $0xd8] sm:$0xff]  ;;  %v323_v56 = vld [vmem:[%s1153_s24 + $0xe8] sm:$0xff]  ;;  %v354_v58 = vpack.c.bf16 %v320_v53, %v318_v52  ;;  %v322_v60 = vld [vmem:[%s1153_s24 + $0xe0] sm:$0xff] }
  0x88   : > { %378 = vmatpush1.bf16.msra.mxu0 %v346_v20  ;;  %641 = vmatpush1.bf16.msra.mxu1 %v346_v20  ;;  %v283_v46 = vmul.f32 %v279_v41, %v263_v36  ;;  %v285_v47 = vmul.f32 %v279_v41, %v265_v37  ;;  %v287_v48 = vmul.f32 %v279_v41, %v267_v42  ;;  %v325_v57 = vld [vmem:[%s1153_s24 + $0xf8] sm:$0xff]  ;;  %v324_v61 = vld [vmem:[%s1153_s24 + $0xf0] sm:$0xff]  ;;  %v327_v62 = vld [vmem:[%s1153_s24 + $0x108] sm:$0xff] }
  0x89   : > { %379 = vmatprep.subr.bf16.mxu0 %v349_v21  ;;  %630 = vmatprep.subr.bf16.mxu1 %v349_v21  ;;  %v289_v49 = vmul.f32 %v279_v41, %v269_v43  ;;  %v355_v51 = vpack.c.bf16 %v321_v45, %v319_v44  ;;  %v357_v59 = vpack.c.bf16 %v325_v57, %v323_v56  ;;  %v329_v63 = vld [vmem:[%s1153_s24 + $0x118] sm:$0xff]  ;;  %v326_v2 = vld [vmem:[%s1153_s24 + $0x100] sm:$0xff]  ;;  %v328_v3 = vld [vmem:[%s1153_s24 + $0x110] sm:$0xff] }
  0x8a   : > { %v291_v54 = vpack.c.bf16 %v285_v47, %v283_v46  ;;  %v356_v0 = vpack.c.bf16 %v324_v61, %v322_v60  ;;  %v359_v1 = vpack.c.bf16 %v329_v63, %v327_v62  ;;  %v331_v4 = vld [vmem:[%s1153_s24 + $0x128] sm:$0xff]  ;;  %v333_v5 = vld [vmem:[%s1153_s24 + $0x138] sm:$0xff]  ;;  %v358_v6 = vpack.c.bf16 %v328_v3, %v326_v2  ;;  %v330_v8 = vld [vmem:[%s1153_s24 + $0x120] sm:$0xff] }
  0x8b   : > { %v293_v55 = vpack.c.bf16 %v289_v49, %v287_v48  ;;  %v361_v7 = vpack.c.bf16 %v333_v5, %v331_v4  ;;  %v332_v9 = vld [vmem:[%s1153_s24 + $0x130] sm:$0xff]  ;;  %v335_v10 = vld [vmem:[%s1153_s24 + $0x148] sm:$0xff]  ;;  %v337_v11 = vld [vmem:[%s1153_s24 + $0x158] sm:$0xff] }
  0x8c   : > { %380 = vmatpush1.bf16.msra.mxu0 %v348_v27  ;;  %642 = vmatpush1.bf16.msra.mxu1 %v348_v27  ;;  %v360_v13 = vpack.c.bf16 %v332_v9, %v330_v8  ;;  %v363_v14 = vpack.c.bf16 %v337_v11, %v335_v10  ;;  %v334_v15 = vld [vmem:[%s1153_s24 + $0x140] sm:$0xff]  ;;  %v336_v16 = vld [vmem:[%s1153_s24 + $0x150] sm:$0xff]  ;;  %v339_v17 = vld [vmem:[%s1153_s24 + $0x168] sm:$0xff] }
  0x8d   : > { %381 = vmatprep.subr.bf16.mxu0 %v351_v28  ;;  %631 = vmatprep.subr.bf16.mxu1 %v351_v28  ;;  %v341_v18 = vld [vmem:[%s1153_s24 + $0x178] sm:$0xff]  ;;  %v262_v20 = vld [vmem:[#allocation7] sm:$0xff]  ;;  %v362_v21 = vpack.c.bf16 %v336_v16, %v334_v15  ;;  %v264_v22 = vld [vmem:[#allocation7 + $0x10] sm:$0xff] }
  0x8e   : > { %610 = vmatprep.mubr.msk.bf16.mxu0 %vm366_vm0, %v291_v54  ;;  %611 = vmatprep.mubr.msk.bf16.mxu1 %vm366_vm0, %v293_v55  ;;  %v266_v23 = vld [vmem:[#allocation7 + $0x20] sm:$0xff]  ;;  %v268_v24 = vld [vmem:[#allocation7 + $0x30] sm:$0xff]  ;;  %v365_v25 = vpack.c.bf16 %v341_v18, %v339_v17  ;;  %v282_v28 = vmul.f32 %v275_v19, %v262_v20  ;;  %v284_v29 = vmul.f32 %v275_v19, %v264_v22 }
  0x8f   : > { %v338_v26 = vld [vmem:[%s1153_s24 + $0x160] sm:$0xff]  ;;  %v340_v27 = vld [vmem:[%s1153_s24 + $0x170] sm:$0xff]  ;;  %v286_v30 = vmul.f32 %v275_v19, %v266_v23  ;;  %v288_v31 = vmul.f32 %v275_v19, %v268_v24 }
  0x90   : > { %382 = vmatpush1.bf16.msra.mxu0 %v350_v35  ;;  %643 = vmatpush1.bf16.msra.mxu1 %v350_v35  ;;  %v364_v32 = vpack.c.bf16 %v340_v27, %v338_v26  ;;  %v290_v33 = vpack.c.bf16 %v284_v29, %v282_v28 }
  0x91   : > { %383 = vmatprep.subr.bf16.mxu0 %v353_v39  ;;  %632 = vmatprep.subr.bf16.mxu1 %v353_v39  ;;  %v292_v34 = vpack.c.bf16 %v288_v31, %v286_v30 }
  0x94   : > { %384 = vmatpush1.bf16.msra.mxu0 %v352_v50  ;;  %644 = vmatpush1.bf16.msra.mxu1 %v352_v50 }
  0x95   : > { %385 = vmatprep.subr.bf16.mxu0 %v355_v51  ;;  %633 = vmatprep.subr.bf16.mxu1 %v355_v51 }
  0x98   : > { %386 = vmatpush1.bf16.msra.mxu0 %v354_v58  ;;  %645 = vmatpush1.bf16.msra.mxu1 %v354_v58 }
  0x99   : > { %387 = vmatprep.subr.bf16.mxu0 %v357_v59  ;;  %634 = vmatprep.subr.bf16.mxu1 %v357_v59 }
  0x9c   : > { %388 = vmatpush1.bf16.msra.mxu0 %v356_v0  ;;  %646 = vmatpush1.bf16.msra.mxu1 %v356_v0 }
  0x9d   : > { %389 = vmatprep.subr.bf16.mxu0 %v359_v1  ;;  %635 = vmatprep.subr.bf16.mxu1 %v359_v1 }
  0xa0   : > { %390 = vmatpush1.bf16.msra.mxu0 %v358_v6  ;;  %647 = vmatpush1.bf16.msra.mxu1 %v358_v6 }
  0xa1   : > { %391 = vmatprep.subr.bf16.mxu0 %v361_v7  ;;  %636 = vmatprep.subr.bf16.mxu1 %v361_v7 }
  0xa4   : > { %392 = vmatpush1.bf16.msra.mxu0 %v360_v13  ;;  %648 = vmatpush1.bf16.msra.mxu1 %v360_v13 }
  0xa5   : > { %393 = vmatprep.subr.bf16.mxu0 %v363_v14  ;;  %637 = vmatprep.subr.bf16.mxu1 %v363_v14 }
  0xa8   : > { %394 = vmatpush1.bf16.msra.mxu0 %v362_v21  ;;  %649 = vmatpush1.bf16.msra.mxu1 %v362_v21 }
  0xa9   : > { %395 = vmatprep.subr.bf16.mxu0 %v365_v25  ;;  %638 = vmatprep.subr.bf16.mxu1 %v365_v25 }
  0xac   : > { %396 = vmatpush1.bf16.msra.mxu0 %v364_v32  ;;  %650 = vmatpush1.bf16.msra.mxu1 %v364_v32 }
  0xaf   : > { %406 = vmatmul.mubr.bf16.vlgmr.msra.gmra.mrb[0].mxu0 %v290_v33  ;;  %416 = vmatmul.mubr.bf16.vlgmr.msra.gmra.mrb[0].mxu1 %v292_v34 }
 0x182   : > { %v407_v35 = vpop.f32.mrb[0].mxu0  ;;  %v417_v36 = vpop.f32.mrb[0].mxu1 }
 0x183   : > { %v426_v37 = vmax.f32 %v407_v35, 0.0  ;;  %v430_v38 = vmax.f32 %v417_v36, 0.0  ;;  %v409_v39 = vpop.f32.mrb[1].mxu0  ;;  %v419_v40 = vpop.f32.mrb[1].mxu1 }
 0x184   : > { %v427_v41 = vmax.f32 %v409_v39, 0.0  ;;  %v431_v42 = vmax.f32 %v419_v40, 0.0  ;;  %v411_v43 = vpop.f32.mrb[2].mxu0  ;;  %v421_v44 = vpop.f32.mrb[2].mxu1 }
 0x185   : > { %v428_v45 = vmax.f32 %v411_v43, 0.0  ;;  %v432_v46 = vmax.f32 %v421_v44, 0.0  ;;  %v413_v47 = vpop.f32.mrb[3].mxu0  ;;  %v423_v48 = vpop.f32.mrb[3].mxu1 }
 0x186   : > { %v622_v49 = vpack.c.bf16 %v427_v41, %v426_v37  ;;  %v624_v50 = vpack.c.bf16 %v431_v42, %v430_v38  ;;  %v429_v51 = vmax.f32 %v413_v47, 0.0  ;;  %v433_v52 = vmax.f32 %v423_v48, 0.0 }
 0x188   : > { %458 = vst [vmem:[%s258_s20] sm:$0xff] %v622_v49  ;;  %460 = vst [vmem:[%s258_s20 + $0x10] sm:$0xff] %v624_v50  ;;  %v623_v53 = vpack.c.bf16 %v429_v51, %v428_v45  ;;  %v625_v54 = vpack.c.bf16 %v433_v52, %v432_v46 }
 0x18a   : > { %459 = vst [vmem:[%s258_s20 + $0x8] sm:$0xff] %v623_v53  ;;  %461 = vst [vmem:[%s258_s20 + $0x18] sm:$0xff] %v625_v54 }
 0x18b   : > { %837 = shalt.err (!%p834_p8)
}
 0x18c   : > { %s838_s10 = scalar_lea.hbm %s1227_s7, 512  ;;  %s842_s11 = scalar_lea.hbm %s1279_s3, 1024 }
 0x18d   : > { %p839_p11 = scmp.ne.s32.totalorder %s1227_s7, %s838_s10  ;;  %p843_p6 = scmp.lt.u32.totalorder %s1227_s7, %s1279_s3 }
 0x18e   : > { %p844_p13 = scmp.lt.u32.totalorder %s842_s11, %s838_s10  ;;  %p846_p5 = scmp.lt.u32.totalorder %s838_s10, %s1227_s7 }
 0x18f   : > { %p840_p12 = pnand %p839_p11, %p1039_p10 }
 0x190   : > { %p845_p0 = por %p844_p13, %p843_p6 }
 0x191   : > { %p841_p3 = pneg %p840_p12 }
 0x192   : > { %p847_p9 = por %p846_p5, %p845_p0 }
 0x194   : > { %p848_p1 = pnand %p847_p9, %p841_p3 }
 0x196   : > { %851 = shalt.err (!%p848_p1)
}
 0x197   : > { %s922_s18 = smov 128   ;;  %s923_s20 = smov 8  }
 0x198   : > { %662 = dma.vmem_to_hbm [thread:$0]  (%p1039_p10), %s1222_s8, 512, %s1227_s7, %s463_s15, %s922_s18, %s922_s18, %s923_s20  }
 0x199 PF: > { %s493_s4 = sand.u32 1, %s894_s12   ;;  %p1302_p2 = scmp.ne.s32.totalorder %s1287_s21, 0 }
 0x19a   : > { %p1303_p7 = scmp.ge.s32.totalorder %s914_s17, 2  ;;  %s494_s30 = scalar_lea.sflag [#allocation4], %s493_s4 }
 0x19c   : > { %p676_p4 = pnand %p1303_p7, %p1302_p2 }
 0x19e   : > { %889 = dma.done.wait (!%p676_p4), %s494_s30, 512  }
 0x19f   : > { %891 = vsyncadd (!%p676_p4), %s494_s30, 4294966784  ;;  %s22_s17 = sadd.s32 1, %s914_s17   ;;  %s1304_s12 = smov %s898_s13 }
 0x1a0   : > { %p19_p8 = scmp.ge.s32.totalorder %s22_s17, 4   ;;  %s1305_s13 = smov %s902_s14 }
 0x1a1   : > { %s1306_s14 = smov %s1051_s29  ;;  %s1307_s15 = smov %s910_s16 }
 0x1a2   : > { %s1308_s16 = smov %s1310_s26  ;;  %21 = sbr.rel (!%p19_p8) target bundleno = 10 (0xa), region = 94 }
 0x1a9   :  { %499 = vsyncpa [#allocation3], 1 }
 0x1aa   :  { %501 = vsyncpa [#allocation3 + $0x1], 1 }
 0x1ab   :  { %502 = vsyncpa [#allocation6], 1 }
 0x1ac   :  { %504 = vsyncpa [#allocation6 + $0x1], 1 }
 0x1ad   :  { %505 = vsyncpa [#allocation4], 1 }
 0x1ae   :  { %507 = vsyncpa [#allocation4 + $0x1], 1 }

</bundles_post_ra>
